<compile_context>
chip_gen: v6e
topology: v6e:2x2x1
jax: 0.10.0
libtpu: 0.0.40
codegen_flags: <defaults>
</compile_context>

<pallas_src>
import functools

import jax
import jax.numpy as jnp
from jax.experimental import pallas as pl
from jax.experimental.pallas import tpu as pltpu


def actor_kernel(x_ref, w1_ref, b1_ref, w2_ref, b2_ref, w3_ref, b3_ref, out_ref,
                 *, two_class):
    """One batch tile of the Actor forward in batch-on-lanes (transposed) layout.

    Shapes (bt = batch tile; batch is the lane axis throughout):
      x_ref  : (in_dim, bt)   f32 activations
      w1_ref : (128, in_dim)  (bf16 or f32, pre-cast by wrapper), b1_ref: (128, 1) f32
      w2_ref : (64, 128)                                        , b2_ref: (64, 1)  f32
      w3_ref : (out_dim, 64)  (softmax-difference already folded), b3_ref: (out_dim, 1) f32
      out_ref: (out_dim, bt)  f32

    Accumulation and all elementwise math stay in f32. Edge (masked) blocks
    carry garbage batch lanes; every op here is per-lane (matmuls contract
    over features only), so garbage never mixes into valid columns and the
    out-of-bounds lanes are discarded on writeback.
    """
    w1 = w1_ref[...]
    x = x_ref[...].astype(w1.dtype)

    # fc1 + ReLU -> (128, bt)
    h1 = jnp.dot(w1, x, preferred_element_type=jnp.float32)
    h1 = jnp.maximum(h1 + b1_ref[...], 0.0)

    # fc2 + ReLU -> (64, bt)
    h2 = jnp.dot(w2_ref[...], h1.astype(w1.dtype), preferred_element_type=jnp.float32)
    h2 = jnp.maximum(h2 + b2_ref[...], 0.0)

    # fc3 -> (out_dim, bt)
    logits = jnp.dot(w3_ref[...], h2.astype(w1.dtype), preferred_element_type=jnp.float32)
    logits = logits + b3_ref[...]

    if two_class:
        # Wrapper folded D = [[1,-1],[-1,1]] into w3/b3, so row 0 holds
        # (l0 - l1) and row 1 holds (l1 - l0): softmax == elementwise sigmoid,
        # each class computed directly (EUP/VPU only, no cross-lane work).
        probs = 1.0 / (1.0 + jnp.exp(-logits))
    else:
        # Generic softmax over the class (sublane) axis; batch stays per-lane.
        m = jnp.max(logits, axis=0, keepdims=True)
        e = jnp.exp(logits - m)
        probs = e / jnp.sum(e, axis=0, keepdims=True)

    out_ref[...] = probs.astype(out_ref.dtype)


@functools.partial(jax.jit, static_argnames=("batch_tile", "use_bf16"))
def actor_forward(x, params, batch_tile=8192, use_bf16=True):
    """x: (B, input_size) f32. params in PyTorch nn.Linear layout:
       (w1 (128,in), b1 (128,), w2 (64,128), b2 (64,), w3 (out,64), b3 (out,)).
       Returns (B, output_size) action probabilities (f32)."""
    w1, b1, w2, b2, w3, b3 = params
    B, in_dim = x.shape
    out_dim = w3.shape[0]
    two_class = (out_dim == 2)

    # ---- wrapper-side param prep (tiny XLA ops, once per call, never in-kernel) ----
    wdt = jnp.bfloat16 if use_bf16 else jnp.float32
    if two_class:
        # Fold the softmax-difference matrix into fc3 so the kernel only needs
        # an elementwise sigmoid.
        d = jnp.array([[1.0, -1.0], [-1.0, 1.0]], jnp.float32)
        w3p = d @ w3
        b3p = d @ b3
    else:
        w3p, b3p = w3, b3
    w1c = w1.astype(wdt)
    w2c = w2.astype(wdt)
    w3c = w3p.astype(wdt)
    b1c = b1.reshape(-1, 1).astype(jnp.float32)
    b2c = b2.reshape(-1, 1).astype(jnp.float32)
    b3c = b3p.reshape(-1, 1).astype(jnp.float32)

    # Batch on the lane axis: lane-dense input and output blocks.
    xt = x.T  # (in_dim, B)

    # Tile selection: a single grid step when the whole batch fits (block may
    # equal the full array dims); otherwise tiles must be a multiple of 128
    # (lane granularity of the dense blocks). No forced multi-step split for
    # small batches — on 1-TC chips that is pure per-step overhead.
    if B <= batch_tile:
        bt = B
    else:
        bt = max(128, (batch_tile // 128) * 128)
    grid = (pl.cdiv(B, bt),)

    flops = 2 * B * (in_dim * 128 + 128 * 64 + 64 * out_dim)
    bytes_accessed = 4 * (B * in_dim + B * out_dim) + sum(
        int(p.size) * p.dtype.itemsize for p in (w1c, b1c, w2c, b2c, w3c, b3c))
    cost = pl.CostEstimate(flops=flops,
                           transcendentals=B * out_dim,
                           bytes_accessed=bytes_accessed)

    out_t = pl.pallas_call(
        functools.partial(actor_kernel, two_class=two_class),
        out_shape=jax.ShapeDtypeStruct((out_dim, B), jnp.float32),
        grid_spec=pltpu.PrefetchScalarGridSpec(
            num_scalar_prefetch=0,
            grid=grid,
            in_specs=[
                # batch-tiled activations (edge block masked by Pallas)
                pl.BlockSpec((in_dim, bt), lambda i: (0, i)),
                # weights / biases: full blocks, resident across all grid steps
                pl.BlockSpec(w1c.shape, lambda i: (0, 0)),
                pl.BlockSpec(b1c.shape, lambda i: (0, 0)),
                pl.BlockSpec(w2c.shape, lambda i: (0, 0)),
                pl.BlockSpec(b2c.shape, lambda i: (0, 0)),
                pl.BlockSpec(w3c.shape, lambda i: (0, 0)),
                pl.BlockSpec(b3c.shape, lambda i: (0, 0)),
            ],
            out_specs=pl.BlockSpec((out_dim, bt), lambda i: (0, i)),
        ),
        compiler_params=pltpu.CompilerParams(
            dimension_semantics=("parallel",),
            vmem_limit_bytes=32 * 1024 * 1024,
        ),
        cost_estimate=cost,
    )(xt, w1c, b1c, w2c, b2c, w3c, b3c)

    # Back to the PyTorch (B, out_dim) layout. Consumers that can use the
    # (out_dim, B) layout directly may skip this transpose.
    return out_t.T


def init_actor_params(key, input_size=7, output_size=2):
    """Deterministic init mirroring nn.Linear (weight (out,in), bias (out,),
    U(-1/sqrt(fan_in), 1/sqrt(fan_in)))."""
    dims = [(input_size, 128), (128, 64), (64, output_size)]
    params = []
    for fan_in, fan_out in dims:
        key, kw, kb = jax.random.split(key, 3)
        bound = 1.0 / jnp.sqrt(jnp.float32(fan_in))
        w = jax.random.uniform(kw, (fan_out, fan_in), jnp.float32, -bound, bound)
        b = jax.random.uniform(kb, (fan_out,), jnp.float32, -bound, bound)
        params += [w, b]
    return tuple(params)


def actor_reference(x, params):
    """Pure-JAX reference (PyTorch semantics) for correctness checking."""
    w1, b1, w2, b2, w3, b3 = params
    h1 = jnp.maximum(x @ w1.T + b1, 0.0)
    h2 = jnp.maximum(h1 @ w2.T + b2, 0.0)
    return jax.nn.softmax(h2 @ w3.T + b3, axis=-1)


if __name__ == "__main__":
    key = jax.random.PRNGKey(0)
    k_x, k_p = jax.random.split(key)

    input_size, output_size = 7, 2
    params = init_actor_params(k_p, input_size, output_size)

    # (batch, batch_tile): aligned single tile, a non-8-aligned single tile,
    # and a small multi-step grid with a masked edge block.
    for batch, tile in ((8, 8192), (13, 8192), (300, 128)):
        kx = jax.random.fold_in(k_x, batch)
        x = jax.random.normal(kx, (batch, input_size), jnp.float32)
        ref = actor_reference(x, params)

        # Default path: bf16 matmul operands, f32 accumulate/elementwise.
        probs = actor_forward(x, params, batch_tile=tile)
        jax.block_until_ready(probs)
        assert probs.shape == (batch, output_size)
        assert bool(jnp.all(jnp.isfinite(probs)))
        assert jnp.allclose(jnp.sum(probs, axis=-1), 1.0, atol=1e-5)
        assert jnp.allclose(probs, ref, atol=2e-2)

        # Exact f32 path (tight parity with the PyTorch f32 model).
        probs_f32 = actor_forward(x, params, batch_tile=tile, use_bf16=False)
        jax.block_until_ready(probs_f32)
        assert jnp.allclose(jnp.sum(probs_f32, axis=-1), 1.0, atol=1e-5)
        assert jnp.allclose(probs_f32, ref, atol=1e-5, rtol=1e-5)

    print("KERNEL_OK")
</pallas_src>

<mosaic_0001>
module attributes {stable_mosaic.version = 11 : i64} {
  func.func @actor_kernel(%arg0: i32, %arg1: memref<7x8xf32, #tpu.memory_space<vmem>>, %arg2: memref<128x7xbf16, #tpu.memory_space<vmem>>, %arg3: memref<128x1xf32, #tpu.memory_space<vmem>>, %arg4: memref<64x128xbf16, #tpu.memory_space<vmem>>, %arg5: memref<64x1xf32, #tpu.memory_space<vmem>>, %arg6: memref<2x64xbf16, #tpu.memory_space<vmem>>, %arg7: memref<2x1xf32, #tpu.memory_space<vmem>>, %arg8: memref<2x8xf32, #tpu.memory_space<vmem>>) attributes {dimension_semantics = [#tpu.dimension_semantics<parallel>], iteration_bounds = array<i64: 1>, scalar_prefetch = 0 : i64, scratch_operands = 0 : i64, tpu.core_type = #tpu.core_type<tc>, window_params = [{transform_indices = @transform_0, window_bounds = array<i64: 7, 8>}, {pipeline_mode = #tpu.pipeline_mode<synchronous>, transform_indices = @transform_1, window_bounds = array<i64: 128, 7>}, {pipeline_mode = #tpu.pipeline_mode<synchronous>, transform_indices = @transform_2, window_bounds = array<i64: 128, 1>}, {pipeline_mode = #tpu.pipeline_mode<synchronous>, transform_indices = @transform_3, window_bounds = array<i64: 64, 128>}, {pipeline_mode = #tpu.pipeline_mode<synchronous>, transform_indices = @transform_4, window_bounds = array<i64: 64, 1>}, {pipeline_mode = #tpu.pipeline_mode<synchronous>, transform_indices = @transform_5, window_bounds = array<i64: 2, 64>}, {pipeline_mode = #tpu.pipeline_mode<synchronous>, transform_indices = @transform_6, window_bounds = array<i64: 2, 1>}, {transform_indices = @transform_7, window_bounds = array<i64: 2, 8>}]} {
    %c0 = arith.constant 0 : index
    %c0_0 = arith.constant 0 : index
    %0 = vector.load %arg2[%c0, %c0_0] : memref<128x7xbf16, #tpu.memory_space<vmem>>, vector<128x7xbf16>
    %c0_1 = arith.constant 0 : index
    %c0_2 = arith.constant 0 : index
    %1 = vector.load %arg1[%c0_1, %c0_2] : memref<7x8xf32, #tpu.memory_space<vmem>>, vector<7x8xf32>
    %2 = arith.truncf %1 : vector<7x8xf32> to vector<7x8xbf16>
    %cst = arith.constant dense<0.000000e+00> : vector<128x8xf32>
    %3 = tpu.matmul %0, %2, %cst {dimension_numbers = #tpu.dot_dimension_numbers<[1], [0], [0], [1], [0, 0, 1, 1], [], []>} : vector<128x7xbf16>, vector<7x8xbf16>, vector<128x8xf32> -> vector<128x8xf32>
    %c0_3 = arith.constant 0 : index
    %c0_4 = arith.constant 0 : index
    %4 = vector.load %arg3[%c0_3, %c0_4] : memref<128x1xf32, #tpu.memory_space<vmem>>, vector<128x1xf32>
    %5 = vector.broadcast %4 : vector<128x1xf32> to vector<128x8xf32>
    %6 = arith.addf %3, %5 : vector<128x8xf32>
    %cst_5 = arith.constant 0.000000e+00 : f32
    %7 = vector.broadcast %cst_5 : f32 to vector<128x8xf32>
    %8 = arith.maximumf %6, %7 : vector<128x8xf32>
    %c0_6 = arith.constant 0 : index
    %c0_7 = arith.constant 0 : index
    %9 = vector.load %arg4[%c0_6, %c0_7] : memref<64x128xbf16, #tpu.memory_space<vmem>>, vector<64x128xbf16>
    %10 = arith.truncf %8 : vector<128x8xf32> to vector<128x8xbf16>
    %cst_8 = arith.constant dense<0.000000e+00> : vector<64x8xf32>
    %11 = tpu.matmul %9, %10, %cst_8 {dimension_numbers = #tpu.dot_dimension_numbers<[1], [0], [0], [1], [0, 0, 1, 1], [], []>} : vector<64x128xbf16>, vector<128x8xbf16>, vector<64x8xf32> -> vector<64x8xf32>
    %c0_9 = arith.constant 0 : index
    %c0_10 = arith.constant 0 : index
    %12 = vector.load %arg5[%c0_9, %c0_10] : memref<64x1xf32, #tpu.memory_space<vmem>>, vector<64x1xf32>
    %13 = vector.broadcast %12 : vector<64x1xf32> to vector<64x8xf32>
    %14 = arith.addf %11, %13 : vector<64x8xf32>
    %cst_11 = arith.constant 0.000000e+00 : f32
    %15 = vector.broadcast %cst_11 : f32 to vector<64x8xf32>
    %16 = arith.maximumf %14, %15 : vector<64x8xf32>
    %c0_12 = arith.constant 0 : index
    %c0_13 = arith.constant 0 : index
    %17 = vector.load %arg6[%c0_12, %c0_13] : memref<2x64xbf16, #tpu.memory_space<vmem>>, vector<2x64xbf16>
    %18 = arith.truncf %16 : vector<64x8xf32> to vector<64x8xbf16>
    %cst_14 = arith.constant dense<0.000000e+00> : vector<2x8xf32>
    %19 = tpu.matmul %17, %18, %cst_14 {dimension_numbers = #tpu.dot_dimension_numbers<[1], [0], [0], [1], [0, 0, 1, 1], [], []>} : vector<2x64xbf16>, vector<64x8xbf16>, vector<2x8xf32> -> vector<2x8xf32>
    %c0_15 = arith.constant 0 : index
    %c0_16 = arith.constant 0 : index
    %20 = vector.load %arg7[%c0_15, %c0_16] : memref<2x1xf32, #tpu.memory_space<vmem>>, vector<2x1xf32>
    %21 = vector.broadcast %20 : vector<2x1xf32> to vector<2x8xf32>
    %22 = arith.addf %19, %21 : vector<2x8xf32>
    %cst_17 = arith.constant 0.000000e+00 : f32
    %23 = vector.broadcast %cst_17 : f32 to vector<2x8xf32>
    %24 = arith.subf %23, %22 : vector<2x8xf32>
    %25 = math.exp %24 : vector<2x8xf32>
    %cst_18 = arith.constant 1.000000e+00 : f32
    %26 = vector.broadcast %cst_18 : f32 to vector<2x8xf32>
    %27 = arith.addf %26, %25 : vector<2x8xf32>
    %cst_19 = arith.constant 1.000000e+00 : f32
    %28 = vector.broadcast %cst_19 : f32 to vector<2x8xf32>
    %29 = arith.divf %28, %27 : vector<2x8xf32>
    %c0_20 = arith.constant 0 : index
    %c0_21 = arith.constant 0 : index
    %30 = vector.load %arg8[%c0_20, %c0_21] : memref<2x8xf32, #tpu.memory_space<vmem>>, vector<2x8xf32>
    tpu.vector_store %arg8[%c0_20, %c0_21], %29 {strides = array<i32>} : memref<2x8xf32, #tpu.memory_space<vmem>>, vector<2x8xf32>,
    return
  }
  func.func @transform_0(%arg0: i32) -> (i32, i32) {
    %c0_i32 = arith.constant 0 : i32
    %c0_i32_0 = arith.constant 0 : i32
    return %c0_i32, %arg0 : i32, i32
  }
  func.func @transform_1(%arg0: i32) -> (i32, i32) {
    %c0_i32 = arith.constant 0 : i32
    %c0_i32_0 = arith.constant 0 : i32
    %c0_i32_1 = arith.constant 0 : i32
    return %c0_i32, %c0_i32_0 : i32, i32
  }
  func.func @transform_2(%arg0: i32) -> (i32, i32) {
    %c0_i32 = arith.constant 0 : i32
    %c0_i32_0 = arith.constant 0 : i32
    %c0_i32_1 = arith.constant 0 : i32
    return %c0_i32, %c0_i32_0 : i32, i32
  }
  func.func @transform_3(%arg0: i32) -> (i32, i32) {
    %c0_i32 = arith.constant 0 : i32
    %c0_i32_0 = arith.constant 0 : i32
    %c0_i32_1 = arith.constant 0 : i32
    return %c0_i32, %c0_i32_0 : i32, i32
  }
  func.func @transform_4(%arg0: i32) -> (i32, i32) {
    %c0_i32 = arith.constant 0 : i32
    %c0_i32_0 = arith.constant 0 : i32
    %c0_i32_1 = arith.constant 0 : i32
    return %c0_i32, %c0_i32_0 : i32, i32
  }
  func.func @transform_5(%arg0: i32) -> (i32, i32) {
    %c0_i32 = arith.constant 0 : i32
    %c0_i32_0 = arith.constant 0 : i32
    %c0_i32_1 = arith.constant 0 : i32
    return %c0_i32, %c0_i32_0 : i32, i32
  }
  func.func @transform_6(%arg0: i32) -> (i32, i32) {
    %c0_i32 = arith.constant 0 : i32
    %c0_i32_0 = arith.constant 0 : i32
    %c0_i32_1 = arith.constant 0 : i32
    return %c0_i32, %c0_i32_0 : i32, i32
  }
  func.func @transform_7(%arg0: i32) -> (i32, i32) {
    %c0_i32 = arith.constant 0 : i32
    %c0_i32_0 = arith.constant 0 : i32
    return %c0_i32, %arg0 : i32, i32
  }
}

</mosaic_0001>

<bundles_post_ra>
// kernel: actor_forward.1
= control target key start
LH: loop header
LB: loop body
LE: loop exit
PB: predicated region body
PF: predicated region fallthrough
CT: control target
= control target key end

     0   :  { %vm207_vm0 = vcmask 1042432   ;;  %vm208_vm1 = vcmask 1043456   ;;  %v711_v3 = vmov 65535   ;;  %vm182_vm2 = vcmask 56320   ;;  %s893_s0 = inlined_call_operand.vmem [shape: f32[7,8], index: 0, kind: input, shape index: {}]   ;;  %s894_s1 = inlined_call_operand.vmem [shape: bf16[128,7], index: 1, kind: input, shape index: {}]   ;;  %s895_s2 = inlined_call_operand.vmem [shape: f32[128,1], index: 2, kind: input, shape index: {}]   ;;  %s896_s3 = inlined_call_operand.vmem [shape: bf16[64,128], index: 3, kind: input, shape index: {}]   ;;  %s897_s4 = inlined_call_operand.vmem [shape: f32[64,1], index: 4, kind: input, shape index: {}]   ;;  %s898_s5 = inlined_call_operand.vmem [shape: bf16[2,64], index: 5, kind: input, shape index: {}]   ;;  %s899_s6 = inlined_call_operand.vmem [shape: f32[2,1], index: 6, kind: input, shape index: {}]   ;;  %s900_s7 = inlined_call_operand.hbm [shape: f32[2,8], index: 7, kind: output, shape index: {}]  }
   0x1   :  { %v44_v0 = vld [vmem:[%s893_s0] sm:$0x7f]  ;;  %v209_v4 = vsel %vm207_vm0, 4294967295, %v711_v3  ;;  %v712_v7 = vmov 0   ;;  %v674_v8 = vld [vmem:[%s894_s1 + $0x8] sm:$0xff]   ;;  %v675_v9 = vld [vmem:[%s894_s1 + $0x10] sm:$0xff]  }
   0x2   :  { %v673_v1 = vld [vmem:[%s894_s1] sm:$0xff]   ;;  %v45_v2 = vpack.c.bf16 %v44_v0, %v44_v0  ;;  %v210_v5 = vsel %vm208_vm1, %v209_v4, 0  ;;  %671 = vset.pattern.permute.xlu0 %v712_v7  ;;  %672 = vset.pattern.permute.xlu1 %v712_v7  ;;  %v60_v10 = vld [vmem:[%s895_s2 + $0x70] sm:$0xff]  ;;  %v61_v12 = vld [vmem:[%s895_s2 + $0x78] sm:$0xff] }
   0x3   :  { %614 = vmatprep.mubr.msk.bf16.mxu0 %vm182_vm2, %v673_v1  ;;  %v58_v11 = vld [vmem:[%s895_s2 + $0x60] sm:$0xff]  ;;  %134 = vperm.xlu0 %671, %v60_v10   ;;  %v59_v13 = vld [vmem:[%s895_s2 + $0x68] sm:$0xff]  ;;  %v676_v14 = vld [vmem:[%s894_s1 + $0x18] sm:$0xff]  }
   0x4   :  { %v212_v6 = vand.u32 %v210_v5, %v45_v2  ;;  %124 = vperm.xlu1 %672, %v58_v11   ;;  %v677_v15 = vld [vmem:[%s894_s1 + $0x20] sm:$0xff]   ;;  %v56_v16 = vld [vmem:[%s895_s2 + $0x50] sm:$0xff]  ;;  %v57_v17 = vld [vmem:[%s895_s2 + $0x58] sm:$0xff] }
   0x5   :  { %v54_v18 = vld [vmem:[%s895_s2 + $0x40] sm:$0xff]  ;;  %v55_v19 = vld [vmem:[%s895_s2 + $0x48] sm:$0xff] }
   0x6   :  { %612 = vmatprep.subr.bf16.mxu0 %v212_v6 }
   0x7   :  { %613 = vmatpush3.bf16.msra.mxu0 %v212_v6  ;;  %139 = vperm.xlu0 %671, %v61_v12  }
   0x8   :  { %129 = vperm.xlu1 %672, %v59_v13  }
   0xa   :  { %615 = vmatmul.mubr.msk.bf16.vlgmr.msra.gmra.mxu0 %vm182_vm2, %v674_v8 }
   0xb   :  { %618 = vmatprep.mubr.msk.bf16.mxu0 %vm182_vm2, %v675_v9  ;;  %114 = vperm.xlu0 %671, %v56_v16  }
   0xc   :  { %119 = vperm.xlu1 %672, %v57_v17  }
  0x12   :  { %619 = vmatmul.mubr.msk.bf16.gmra.mxu0 %vm182_vm2, %v676_v14 }
  0x13   :  { %622 = vmatprep.mubr.msk.bf16.mxu0 %vm182_vm2, %v677_v15 }
  0x14   :  { %12 = vsyncpa [#allocation3], 0  ;;  %v678_v20 = vld [vmem:[%s894_s1 + $0x28] sm:$0xff]   ;;  %v679_v21 = vld [vmem:[%s894_s1 + $0x30] sm:$0xff]   ;;  %104 = vperm.xlu0 %671, %v54_v18   ;;  %109 = vperm.xlu1 %672, %v55_v19   ;;  %vm714_vm3 = vmmov 0   ;;  %vm499_vm4 = vcmask 523264  }
  0x15   :  { %v52_v22 = vld [vmem:[%s895_s2 + $0x30] sm:$0xff]  ;;  %v53_v23 = vld [vmem:[%s895_s2 + $0x38] sm:$0xff]  ;;  %v50_v24 = vld [vmem:[%s895_s2 + $0x20] sm:$0xff]  ;;  %vm549_vm5 = vcmask 58368  }
  0x16   :  { %v51_v25 = vld [vmem:[%s895_s2 + $0x28] sm:$0xff]  ;;  %v680_v26 = vld [vmem:[%s894_s1 + $0x38] sm:$0xff]   ;;  %v48_v27 = vld [vmem:[%s895_s2 + $0x10] sm:$0xff]  ;;  %s715_s1 = smov [#allocation2]  }
  0x17   :  { %v49_v28 = vld [vmem:[%s895_s2 + $0x18] sm:$0xff]  ;;  %v46_v29 = vld [vmem:[%s895_s2] sm:$0xff]  ;;  %v47_v30 = vld [vmem:[%s895_s2 + $0x8] sm:$0xff]  ;;  %s557_s25 = sshll.u32 %s715_s1, 4  ;;  %s558_s25 = int_to_ptr.vmem [resolvable:$true] %s557_s25 }
  0x18   :  { %94 = vperm.xlu0 %671, %v52_v22   ;;  %99 = vperm.xlu1 %672, %v53_v23   ;;  %v349_v31 = vld [vmem:[%s897_s4 + $0x30] sm:$0xff]  ;;  %v350_v32 = vld [vmem:[%s897_s4 + $0x38] sm:$0xff]  ;;  %v347_v33 = vld [vmem:[%s897_s4 + $0x20] sm:$0xff]  ;;  %p694_p1 = scmp.lt.s32.totalorder %s558_s25, %s558_s25 }
  0x19   :  { %v348_v34 = vld [vmem:[%s897_s4 + $0x28] sm:$0xff]  ;;  %v345_v35 = vld [vmem:[%s897_s4 + $0x10] sm:$0xff]  ;;  %v346_v36 = vld [vmem:[%s897_s4 + $0x18] sm:$0xff] }
  0x1a   :  { %623 = vmatmul.mubr.msk.bf16.gmra.mxu0 %vm182_vm2, %v678_v20  ;;  %v343_v37 = vld [vmem:[%s897_s4] sm:$0xff]  ;;  %v344_v38 = vld [vmem:[%s897_s4 + $0x8] sm:$0xff] }
  0x1b   :  { %626 = vmatprep.mubr.msk.bf16.mxu0 %vm182_vm2, %v679_v21  ;;  %v493_v39 = vld [vmem:[%s899_s6] sm:$0x3] }
  0x1c   :  { %84 = vperm.xlu0 %671, %v50_v24   ;;  %89 = vperm.xlu1 %672, %v51_v25   ;;  %v681_v40 = vld [vmem:[%s896_s3] sm:$0xff]  }
  0x1d   :  { %646 = vmatprep.mubr.bf16.mxu1 %v681_v40 }
  0x20   :  { %74 = vperm.xlu0 %671, %v48_v27   ;;  %79 = vperm.xlu1 %672, %v49_v28  }
  0x22   :  { %627 = vmatmul.mubr.msk.bf16.gmra.mxu0 %vm182_vm2, %v680_v26 }
  0x24   :  { %64 = vperm.xlu0 %671, %v46_v29   ;;  %69 = vperm.xlu1 %672, %v47_v30  }
  0x28   :  { %383 = vperm.xlu0 %671, %v349_v31   ;;  %388 = vperm.xlu1 %672, %v350_v32  }
  0x2c   :  { %373 = vperm.xlu0 %671, %v347_v33   ;;  %378 = vperm.xlu1 %672, %v348_v34  }
  0x30   :  { %363 = vperm.xlu0 %671, %v345_v35   ;;  %368 = vperm.xlu1 %672, %v346_v36  }
  0x34   :  { %353 = vperm.xlu0 %671, %v343_v37   ;;  %358 = vperm.xlu1 %672, %v344_v38  }
  0x38   :  { %496 = vperm.xlu0 %671, %v493_v39  }
  0x7e   :  { %v135_v46 = vpop.permute.xlu0 %134 }
  0x7f   :  { %v125_v44 = vpop.permute.xlu1 %124 }
  0x82   :  { %v140_v51 = vpop.permute.xlu0 %139 }
  0x83   :  { %v130_v49 = vpop.permute.xlu1 %129 }
  0x86   :  { %v115_v56 = vpop.permute.xlu0 %114 }
  0x87   :  { %v120_v54 = vpop.permute.xlu1 %119 }
  0x8f   :  { %v110_v59 = vpop.permute.xlu1 %109  ;;  %v105_v61 = vpop.permute.xlu0 %104 }
  0x93   :  { %v100_v3 = vpop.permute.xlu1 %99  ;;  %v95_v9 = vpop.permute.xlu0 %94 }
  0x97   :  { %v90_v17 = vpop.permute.xlu1 %89  ;;  %v85_v20 = vpop.permute.xlu0 %84 }
  0x9b   :  { %v80_v26 = vpop.permute.xlu1 %79  ;;  %v75_v30 = vpop.permute.xlu0 %74 }
  0x9f   :  { %v70_v36 = vpop.permute.xlu1 %69  ;;  %v65_v39 = vpop.permute.xlu0 %64 }
  0xca   :  { %v869_v41 = vpop.f32.mrf.mxu0 }
  0xcb   :  { %v257_v37 = vadd.f32 %v869_v41, %v75_v30  ;;  %v682_v41 = vld [vmem:[%s896_s3 + $0x8] sm:$0xff]  }
  0xcc   :  { %v871_v42 = vpop.f32.mrf.mxu0 }
  0xce   :  { %v617_v43 = vpop.f32.mrf.mxu0 }
  0xcf   :  { %v260_v33 = vadd.f32 %v617_v43, %v80_v26 }
  0xd0   :  { %v873_v45 = vpop.f32.mrf.mxu0 }
  0xd1   :  { %v314_v40 = vmax.f32 %v260_v33, 0.0 }
  0xd2   :  { %v620_v47 = vpop.f32.mrf.mxu0 }
  0xd3   :  { %v273_v24 = vadd.f32 %v620_v47, %v95_v9  ;;  %v313_v47 = vmax.f32 %v257_v37, 0.0 }
  0xd4   :  { %v264_v48 = vpop.f32.mrf.mxu0 }
  0xd5   :  { %v317_v31 = vmax.f32 %v273_v24, 0.0  ;;  %v265_v32 = vadd.f32 %v264_v48, %v85_v20  ;;  %v336_v48 = vpack.c.bf16 %v314_v40, %v313_v47 }
  0xd6   :  { %v621_v50 = vpop.f32.mrf.mxu0 }
  0xd7   :  { %v276_v21 = vadd.f32 %v621_v50, %v100_v3  ;;  %v315_v38 = vmax.f32 %v265_v32, 0.0 }
  0xd8   :  { %v267_v52 = vpop.f32.mrf.mxu0 }
  0xd9   :  { %v318_v27 = vmax.f32 %v276_v21, 0.0  ;;  %v268_v28 = vadd.f32 %v267_v52, %v90_v17  ;;  %v713_v52 = vmov 0.0  }
  0xda   :  { %v624_v53 = vpop.f32.mrf.mxu0  ;;  %654 = vmatprep.subr.bf16.mxu0 %v713_v52  ;;  %662 = vmatprep.mubr.msk.bf16.mxu0 %vm714_vm3, %v713_v52 }
  0xdb   :  { %v289_v10 = vadd.f32 %v624_v53, %v115_v56  ;;  %v338_v34 = vpack.c.bf16 %v318_v27, %v317_v31  ;;  %v316_v35 = vmax.f32 %v268_v28, 0.0  ;;  %v384_v56 = vpop.permute.xlu0 %383 }
  0xdc   :  { %v280_v55 = vpop.f32.mrf.mxu0 }
  0xdd   :  { %v321_v18 = vmax.f32 %v289_v10, 0.0  ;;  %v281_v19 = vadd.f32 %v280_v55, %v105_v61 }
  0xde   :  { %v625_v57 = vpop.f32.mrf.mxu0 }
  0xdf   :  { %v292_v5 = vadd.f32 %v625_v57, %v120_v54  ;;  %v319_v25 = vmax.f32 %v281_v19, 0.0  ;;  %v389_v54 = vpop.permute.xlu1 %388  ;;  %v374_v61 = vpop.permute.xlu0 %373 }
  0xe0   :  { %v283_v58 = vpop.f32.mrf.mxu0 }
  0xe1   :  { %v322_v14 = vmax.f32 %v292_v5, 0.0  ;;  %v284_v15 = vadd.f32 %v283_v58, %v110_v59 }
  0xe2   :  { %v628_v60 = vpop.f32.mrf.mxu0 }
  0xe3   :  { %v305_v63 = vadd.f32 %v628_v60, %v135_v46  ;;  %v340_v22 = vpack.c.bf16 %v322_v14, %v321_v18  ;;  %v320_v23 = vmax.f32 %v284_v15, 0.0  ;;  %v337_v46 = vpack.c.bf16 %v316_v35, %v315_v38  ;;  %v379_v59 = vpop.permute.xlu1 %378 }
  0xe4   :  { %v296_v62 = vpop.f32.mrf.mxu0 }
  0xe5   :  { %v297_v1 = vadd.f32 %v296_v62, %v125_v44  ;;  %v325_v6 = vmax.f32 %v305_v63, 0.0  ;;  %v339_v29 = vpack.c.bf16 %v320_v23, %v319_v25  ;;  %v252_v44 = vadd.f32 %v873_v45, %v70_v36  ;;  %v683_v45 = vld [vmem:[%s896_s3 + $0x10] sm:$0xff]   ;;  %v488_v25 = vld [vmem:[%s898_s5] sm:$0x1]  ;;  %s689_s5 = scalar_lea.vmem %s558_s25, 32 }
  0xe6   :  { %v629_v0 = vpop.f32.mrf.mxu0  ;;  %p690_p0 = scmp.ne.s32.totalorder %s558_s25, %s689_s5  ;;  %p695_p2 = scmp.lt.s32.totalorder %s689_s5, %s689_s5 }
  0xe7   :  { %v308_v2 = vadd.f32 %v629_v0, %v140_v51  ;;  %v323_v11 = vmax.f32 %v297_v1, 0.0  ;;  %v312_v43 = vmax.f32 %v252_v44, 0.0 }
  0xe8   :  { %v299_v4 = vpop.f32.mrf.mxu0  ;;  %p696_p3 = por %p695_p2, %p694_p1 }
  0xe9   :  { %v326_v7 = vmax.f32 %v308_v2, 0.0  ;;  %v300_v8 = vadd.f32 %v299_v4, %v130_v49  ;;  %v249_v49 = vadd.f32 %v871_v42, %v65_v39  ;;  %v684_v42 = vld [vmem:[%s896_s3 + $0x18] sm:$0xff]   ;;  %v369_v2 = vpop.permute.xlu1 %368 }
  0xea   :  { %p697_p4 = pnand %p696_p3, %p690_p0 }
  0xeb   :  { %v324_v12 = vmax.f32 %v300_v8, 0.0  ;;  %v342_v13 = vpack.c.bf16 %v326_v7, %v325_v6  ;;  %v311_v50 = vmax.f32 %v249_v49, 0.0  ;;  %v364_v8 = vpop.permute.xlu0 %363 }
  0xed   :  { %v341_v16 = vpack.c.bf16 %v324_v12, %v323_v11  ;;  %630 = vmatprep.subr.bf16.mxu1 %v342_v13  ;;  %v335_v51 = vpack.c.bf16 %v312_v43, %v311_v50  ;;  %v359_v14 = vpop.permute.xlu1 %358 }
  0xee   :  { %631 = vmatpush3.bf16.msra.mxu1 %v342_v13 }
  0xef   :  { %632 = vmatprep.subr.bf16.mxu1 %v341_v16  ;;  %v354_v18 = vpop.permute.xlu0 %353 }
  0xf2   :  { %633 = vmatpush3.bf16.msra.mxu1 %v341_v16 }
  0xf3   :  { %634 = vmatprep.subr.bf16.mxu1 %v340_v22  ;;  %v497_v26 = vpop.permute.xlu0 %496 }
  0xf6   :  { %635 = vmatpush3.bf16.msra.mxu1 %v340_v22 }
  0xf7   :  { %636 = vmatprep.subr.bf16.mxu1 %v339_v29 }
  0xfa   :  { %637 = vmatpush3.bf16.msra.mxu1 %v339_v29 }
  0xfb   :  { %638 = vmatprep.subr.bf16.mxu1 %v338_v34 }
  0xfe   :  { %639 = vmatpush3.bf16.msra.mxu1 %v338_v34 }
  0xff   :  { %640 = vmatprep.subr.bf16.mxu1 %v337_v46 }
 0x102   :  { %641 = vmatpush3.bf16.msra.mxu1 %v337_v46 }
 0x103   :  { %642 = vmatprep.subr.bf16.mxu1 %v336_v48 }
 0x106   :  { %643 = vmatpush3.bf16.msra.mxu1 %v336_v48 }
 0x107   :  { %644 = vmatprep.subr.bf16.mxu1 %v335_v51 }
 0x10a   :  { %645 = vmatpush3.bf16.msra.mxu1 %v335_v51 }
 0x10d   :  { %647 = vmatmul.mubr.bf16.vlgmr.msra.gmra.mxu1 %v682_v41 }
 0x10e   :  { %650 = vmatprep.mubr.bf16.mxu1 %v683_v45 }
 0x115   :  { %651 = vmatmul.mubr.bf16.gmra.mxu1 %v684_v42 }
 0x1cd   :  { %v648_v53 = vpop.f32.mrf.mxu1 }
 0x1ce   :  { %v458_v12 = vadd.f32 %v648_v53, %v364_v8 }
 0x1cf   :  { %v449_v55 = vpop.f32.mrf.mxu1 }
 0x1d0   :  { %v482_v19 = vmax.f32 %v458_v12, 0.0  ;;  %v450_v20 = vadd.f32 %v449_v55, %v354_v18 }
 0x1d1   :  { %v649_v57 = vpop.f32.mrf.mxu1 }
 0x1d2   :  { %v461_v9 = vadd.f32 %v649_v57, %v369_v2  ;;  %v480_v23 = vmax.f32 %v450_v20, 0.0 }
 0x1d3   :  { %v452_v58 = vpop.f32.mrf.mxu1 }
 0x1d4   :  { %v483_v15 = vmax.f32 %v461_v9, 0.0  ;;  %v453_v16 = vadd.f32 %v452_v58, %v359_v14 }
 0x1d5   :  { %v652_v60 = vpop.f32.mrf.mxu1 }
 0x1d6   :  { %v474_v63 = vadd.f32 %v652_v60, %v384_v56  ;;  %v490_v21 = vpack.c.bf16 %v483_v15, %v482_v19  ;;  %v481_v22 = vmax.f32 %v453_v16, 0.0 }
 0x1d7   :  { %v465_v62 = vpop.f32.mrf.mxu1 }
 0x1d8   :  { %v486_v4 = vmax.f32 %v474_v63, 0.0  ;;  %v466_v5 = vadd.f32 %v465_v62, %v374_v61  ;;  %v489_v24 = vpack.c.bf16 %v481_v22, %v480_v23 }
 0x1d9   :  { %v653_v0 = vpop.f32.mrf.mxu1 }
 0x1da   :  { %v477_v1 = vadd.f32 %v653_v0, %v389_v54  ;;  %v484_v13 = vmax.f32 %v466_v5, 0.0 }
 0x1db   :  { %v468_v3 = vpop.f32.mrf.mxu1 }
 0x1dc   :  { %v487_v6 = vmax.f32 %v477_v1, 0.0  ;;  %v469_v7 = vadd.f32 %v468_v3, %v379_v59 }
 0x1de   :  { %v492_v10 = vpack.c.bf16 %v487_v6, %v486_v4  ;;  %v485_v11 = vmax.f32 %v469_v7, 0.0 }
 0x1e0   :  { %655 = vmatpush3.bf16.msra.mxu0 %v492_v10  ;;  %v491_v17 = vpack.c.bf16 %v485_v11, %v484_v13 }
 0x1e1   :  { %656 = vmatprep.subr.bf16.mxu0 %v713_v52 }
 0x1e4   :  { %657 = vmatpush3.bf16.msra.mxu0 %v491_v17 }
 0x1e5   :  { %658 = vmatprep.subr.bf16.mxu0 %v713_v52 }
 0x1e8   :  { %659 = vmatpush3.bf16.msra.mxu0 %v490_v21 }
 0x1e9   :  { %660 = vmatprep.subr.bf16.mxu0 %v713_v52 }
 0x1ec   :  { %661 = vmatpush3.bf16.msra.mxu0 %v489_v24 }
 0x1ef   :  { %663 = vmatmul.mubr.msk.bf16.vlgmr.msra.gmra.mxu0 %vm499_vm4, %v488_v25 }
 0x2af   :  { %v537_v27 = vpop.f32.mrf.mxu0 }
 0x2b0   :  { %v538_v28 = vadd.f32 %v537_v27, %v497_v26 }
 0x2b1   :  { %v664_v29 = vpop.f32.mrf.mxu0 }
 0x2b2   :  { %v543_v30 = vsub.f32 0.0, %v538_v28 }
 0x2b3   :  { %v540_v31 = vpop.f32.mrf.mxu0 }
 0x2b4   :  { %v544_v32 = vmul.f32 1.442695, %v543_v30 }
 0x2b5   :  { %v665_v33 = vpop.f32.mrf.mxu0 }
 0x2b6   :  { %685 = vpow2.f32 %v544_v32 }
 0x2c3   :  { %v686_v34 = vpop.eup %685 }
 0x2c4   :  { %v546_v35 = vadd.f32 1.0, %v686_v34 }
 0x2c6   :  { %687 = vrcp.f32 %v546_v35 }
 0x2d3   :  { %v688_v36 = vpop.eup %687 }
 0x2d4   :  { %550 = vst.msk [vmem:[#allocation2] sm:$0x3] %vm549_vm5, %v688_v36 }
 0x2d5   :  { %700 = shalt.err (!%p697_p4)
}
 0x2d6   :  { %560 = dma.vmem_to_hbm [thread:$0]  %s558_s25, 32, %s900_s7, [#allocation3]  }
 0x2d7   :  { %709 = dma.done.wait [#allocation3], 32  }
 0x2d8   :  { %710 = vsyncadd [#allocation3], 4294967264 }
 0x2d9   :  { %564 = vsyncpa [#allocation3], 1 }

</bundles_post_ra>
